<compile_context>
chip_gen: v7x
topology: tpu7x:2x2x1
jax: 0.10.0
libtpu: 0.0.40
codegen_flags: <defaults>
</compile_context>

<pallas_src>
import functools

import jax
import jax.numpy as jnp
from jax.experimental import pallas as pl
from jax.experimental.pallas import tpu as pltpu


# ---------------------------------------------------------------------------
# Shared per-row focal-loss math.
# ---------------------------------------------------------------------------
def _per_row_focal_loss(logits_ref, tgt_ref, w_ref, *, gamma, has_weight):
    """Per-row focal loss for the current (tm, C) tile, shape (tm, 1) float32."""
    x = logits_ref[...]                                       # (tm, C) native dtype
    tgt = tgt_ref[...]                                        # (tm, 1) int32

    # one-hot(target) mask from a 2-D iota (TPU requires >= 2D iota)
    col = jax.lax.broadcasted_iota(jnp.int32, x.shape, 1)
    onehot = col == tgt                                       # (tm, C) bool

    # max in the native dtype; fold the f32 cast into the subtraction so no full
    # f32 copy of the tile stays live through the body.
    m = jnp.max(x, axis=-1, keepdims=True)
    shifted = x.astype(jnp.float32) - m.astype(jnp.float32)   # (tm, C) f32, <= 0
    e = jnp.exp(shifted)                                      # (tm, C)
    sum_e = jnp.sum(e, axis=-1, keepdims=True)                # (tm, 1)

    # CE = logsumexp(logits) - logits[target] = log(sum_e) - (logits[target] - m)
    shifted_t = jnp.sum(jnp.where(onehot, shifted, 0.0), axis=-1, keepdims=True)
    ce = jnp.log(sum_e) - shifted_t                           # (tm, 1)

    if has_weight:
        # F.cross_entropy(weight=..., reduction='none'): loss_i *= weight[target_i]
        w = w_ref[...].astype(jnp.float32)                    # (1, C)
        w_t = jnp.sum(jnp.where(onehot, w, 0.0), axis=-1, keepdims=True)
        ce = ce * w_t

    if gamma == 0.0:
        return ce * 10.0

    if has_weight:
        # Weight is applied before the exp, so the softmax identity doesn't hold.
        p = jnp.exp(-ce)
    else:
        # p = exp(-ce) = softmax(logits)[target]; reuse exp(logits - m) instead of
        # a second EUP exp on lane-sparse (tm, 1) vregs.
        e_t = jnp.sum(jnp.where(onehot, e, 0.0), axis=-1, keepdims=True)
        p = e_t / sum_e

    omp = jnp.maximum(1.0 - p, 0.0)                           # clamp: no NaN when ce ~ 0
    if float(gamma).is_integer() and 1.0 <= gamma <= 8.0:
        f = omp
        for _ in range(int(gamma) - 1):                       # VPU multiplies, no EUP pow
            f = f * omp
    else:
        f = jnp.power(omp, gamma)
    return f * ce * 10.0


def _chunk_sum(loss, *, total_n, tm, emit):
    """Call emit(partial_sum_of_valid_rows) exactly once per grid step.

    The tail-row validity mask is only evaluated on the last chunk (pl.when);
    interior chunks pay only the plain reduce.
    """
    i = pl.program_id(0)
    last = pl.num_programs(0) - 1

    if total_n % tm == 0:
        emit(jnp.sum(loss))
        return

    @pl.when(i < last)
    def _():
        emit(jnp.sum(loss))

    @pl.when(i == last)
    def _():
        row = jax.lax.broadcasted_iota(jnp.int32, loss.shape, 0) + i * tm
        # mask per-row loss BEFORE the sum: the padded tail rows may hold garbage.
        emit(jnp.sum(jnp.where(row < total_n, loss, 0.0)))


# ---------------------------------------------------------------------------
# Kernel A: resident accumulator output (single-TC chips: v5e / v6e).
# ---------------------------------------------------------------------------
def _focal_kernel_accumulate(logits_ref, tgt_ref, *refs, gamma, total_n, tm, has_weight):
    if has_weight:
        w_ref, out_ref = refs
    else:
        w_ref = None
        (out_ref,) = refs

    @pl.when(pl.program_id(0) == 0)
    def _():
        out_ref[...] = jnp.zeros_like(out_ref)

    loss = _per_row_focal_loss(logits_ref, tgt_ref, w_ref, gamma=gamma, has_weight=has_weight)

    def emit(partial):
        # broadcast-add the scalar over the resident (8, 128) block; every lane
        # carries the same running sum, the wrapper reads [0, 0].
        out_ref[...] += partial

    _chunk_sum(loss, total_n=total_n, tm=tm, emit=emit)

    @pl.when(pl.program_id(0) == pl.num_programs(0) - 1)
    def _():
        out_ref[...] = out_ref[...] / jnp.float32(total_n)


# ---------------------------------------------------------------------------
# Kernel B: per-chunk partial-sum blocks (dual-TC chips: v4 / v5p / v7x).
# ---------------------------------------------------------------------------
def _focal_kernel_partials(logits_ref, tgt_ref, *refs, gamma, total_n, tm, has_weight):
    if has_weight:
        w_ref, out_ref = refs
    else:
        w_ref = None
        (out_ref,) = refs

    loss = _per_row_focal_loss(logits_ref, tgt_ref, w_ref, gamma=gamma, has_weight=has_weight)

    def emit(partial):
        # lane-dense (1, 8, 128) block; every element holds this chunk's partial sum.
        out_ref[...] = jnp.zeros_like(out_ref) + partial

    _chunk_sum(loss, total_n=total_n, tm=tm, emit=emit)


# ---------------------------------------------------------------------------
# Tiling / VMEM plan.
# ---------------------------------------------------------------------------
def _detect_device_kind():
    try:
        dev = jax.devices()[0]
        if dev.platform == "tpu":
            return dev.device_kind.lower()
    except Exception:
        pass
    return ""


def _plan(n, c, dtype, kind):
    """Pick (row_tile, dual_core, vmem_limit_bytes) from the real VMEM footprint."""
    dual = any(tok in kind for tok in ("v4", "v5p", "v7", "7x"))
    itemsize = jnp.dtype(dtype).itemsize

    # Live bytes per tile row:
    #   2x double-buffered (tm, C) logits stream
    # + ~3x (tm, C) f32 in-kernel temporaries (shifted / exp / one-hot selects)
    # + 2x lane-padded (tm, 1) -> (tm, 128) int32 target blocks
    per_row = 2 * c * itemsize + 3 * c * 4 + 2 * 128 * 4

    # ~30% headroom under the tightest scoped default (v7x: 32 MiB of 64 MiB physical;
    # v5e/v6e get a larger budget since their limit can be raised well past default).
    tile_budget = (10 if dual else 22) * 1024 * 1024
    tm_cap = max(8, min(1024, (tile_budget // per_row) // 8 * 8))

    if dual and n > 8:
        # guarantee >= 2 chunks so dimension_semantics=("parallel",) can shard the
        # grid across both TensorCores.
        half = -(-n // 2)            # ceil(n / 2)
        half = -(-half // 8) * 8     # round up to multiple of 8
        tm = min(tm_cap, half)
    else:
        tm = n if n <= tm_cap else tm_cap

    # Derive vmem_limit_bytes from the footprint instead of a fixed 32 MiB.
    weight_pad = 4 * 128 * max(1, -(-c // 128)) * 4
    footprint = tm * per_row + weight_pad + (1 << 20)
    vmem_cap = (48 if dual else 100) * 1024 * 1024
    vmem_limit = int(min(vmem_cap, max(16 * 1024 * 1024, int(footprint * 1.4))))
    return tm, dual, vmem_limit


# ---------------------------------------------------------------------------
# Public wrapper.
# ---------------------------------------------------------------------------
def focal_loss_pallas(logits, target, weight=None, gamma=0.0, row_tile=None):
    """logits: (N, C) float (f32 or bf16); target: (N,) int; weight: optional (C,) float."""
    N, C = logits.shape
    kind = _detect_device_kind()
    tm, dual, vmem_limit = _plan(N, C, logits.dtype, kind)
    if row_tile is not None:
        tm = int(row_tile)
    num_chunks = pl.cdiv(N, tm)
    has_weight = weight is not None

    tgt2d = target.astype(jnp.int32).reshape(N, 1)

    logits_spec_kwargs = {}
    if dual:
        # smaller v7x tiles drain quickly at 3.2 TB/s HBM; 3-deep buffering keeps the
        # pipe full for one extra tile of VMEM.
        logits_spec_kwargs["pipeline_mode"] = pl.Buffered(3)

    in_specs = [
        pl.BlockSpec((tm, C), lambda i: (i, 0), **logits_spec_kwargs),   # streamed logits
        pl.BlockSpec((tm, 1), lambda i: (i, 0)),                         # streamed targets
    ]
    operands = [logits, tgt2d]
    if has_weight:
        in_specs.append(pl.BlockSpec((1, C), lambda i: (0, 0)))          # resident weights
        operands.append(weight.astype(jnp.float32).reshape(1, C))

    common = dict(gamma=float(gamma), total_n=N, tm=tm, has_weight=has_weight)

    if dual:
        kernel = functools.partial(_focal_kernel_partials, **common)
        out_shape = jax.ShapeDtypeStruct((num_chunks, 8, 128), jnp.float32)
        out_specs = pl.BlockSpec((1, 8, 128), lambda i: (i, 0, 0))
        semantics = ("parallel",)
    else:
        kernel = functools.partial(_focal_kernel_accumulate, **common)
        out_shape = jax.ShapeDtypeStruct((8, 128), jnp.float32)
        out_specs = pl.BlockSpec((8, 128), lambda i: (0, 0))
        semantics = ("arbitrary",)

    out = pl.pallas_call(
        kernel,
        out_shape=out_shape,
        grid_spec=pltpu.PrefetchScalarGridSpec(
            num_scalar_prefetch=0,
            grid=(num_chunks,),
            in_specs=in_specs,
            out_specs=out_specs,
        ),
        compiler_params=pltpu.CompilerParams(
            dimension_semantics=semantics,
            vmem_limit_bytes=vmem_limit,
        ),
    )(*operands)

    if dual:
        # finish the (unweighted) mean in the wrapper; divide by the true N.
        return jnp.sum(out[:, 0, 0]) / jnp.float32(N)
    # single-TC path: the kernel already divided by N; every lane holds the result.
    return out[0, 0]


# ---------------------------------------------------------------------------
# Pure-JAX reference (matches PyTorch FocalLoss.forward).
# ---------------------------------------------------------------------------
def _reference(logits, target, weight, gamma):
    logits = logits.astype(jnp.float32)
    lse = jax.scipy.special.logsumexp(logits, axis=-1)
    logit_t = jnp.take_along_axis(logits, target[:, None], axis=-1)[:, 0]
    ce = lse - logit_t
    if weight is not None:
        ce = ce * weight.astype(jnp.float32)[target]
    p = jnp.exp(-ce)
    omp = jnp.maximum(1.0 - p, 0.0)
    return jnp.mean(jnp.power(omp, gamma) * ce * 10.0)


if __name__ == "__main__":
    key = jax.random.PRNGKey(0)
    k1, k2, k3, k4, k5 = jax.random.split(key, 5)

    N, C = 64, 32
    logits = jax.random.normal(k1, (N, C), jnp.float32)
    target = jax.random.randint(k2, (N,), 0, C, jnp.int32)
    weight = jax.random.uniform(k3, (C,), jnp.float32, minval=0.5, maxval=1.5)

    # 1) FocalLoss() defaults: weight=None, gamma=0 (plain mean CE * 10)
    out0 = jax.block_until_ready(focal_loss_pallas(logits, target, weight=None, gamma=0.0))
    ref0 = _reference(logits, target, None, 0.0)
    assert jnp.allclose(out0, ref0, rtol=1e-5, atol=1e-5), (out0, ref0)

    # 2) gamma=2, unweighted (integer-gamma VPU path)
    out1 = jax.block_until_ready(focal_loss_pallas(logits, target, weight=None, gamma=2.0))
    ref1 = _reference(logits, target, None, 2.0)
    assert jnp.allclose(out1, ref1, rtol=1e-5, atol=1e-5), (out1, ref1)

    # 3) gamma=2, per-class weights
    out2 = jax.block_until_ready(focal_loss_pallas(logits, target, weight=weight, gamma=2.0))
    ref2 = _reference(logits, target, weight, 2.0)
    assert jnp.allclose(out2, ref2, rtol=1e-5, atol=1e-5), (out2, ref2)

    # 4) non-integer gamma, N not a multiple of the forced row tile
    #    (exercises multi-chunk accumulation + last-chunk tail mask + jnp.power path)
    N2 = 100
    logits2 = jax.random.normal(k4, (N2, C), jnp.float32)
    target2 = jax.random.randint(k5, (N2,), 0, C, jnp.int32)
    out3 = jax.block_until_ready(
        focal_loss_pallas(logits2, target2, weight=None, gamma=1.5, row_tile=24))
    ref3 = _reference(logits2, target2, None, 1.5)
    assert jnp.allclose(out3, ref3, rtol=1e-5, atol=1e-5), (out3, ref3)

    print("KERNEL_OK")
</pallas_src>

<mosaic_0001>
module attributes {stable_mosaic.version = 11 : i64} {
  func.func @_focal_kernel_accumulate(%arg0: i32, %arg1: memref<64x32xf32, #tpu.memory_space<vmem>>, %arg2: memref<64x1xi32, #tpu.memory_space<vmem>>, %arg3: memref<8x128xf32, #tpu.memory_space<vmem>>) attributes {dimension_semantics = [#tpu.dimension_semantics<arbitrary>], iteration_bounds = array<i64: 1>, scalar_prefetch = 0 : i64, scratch_operands = 0 : i64, tpu.core_type = #tpu.core_type<tc>, window_params = [{transform_indices = @transform_0, window_bounds = array<i64: 64, 32>}, {transform_indices = @transform_1, window_bounds = array<i64: 64, 1>}, {pipeline_mode = #tpu.pipeline_mode<synchronous>, transform_indices = @transform_2, window_bounds = array<i64: 8, 128>}]} {
    %c0_i32 = arith.constant 0 : i32
    %0 = arith.cmpi eq, %arg0, %c0_i32 : i32
    %1 = arith.extui %0 : i1 to i32
    %c0_i32_0 = arith.constant 0 : i32
    %2 = arith.cmpi ne, %1, %c0_i32_0 : i32
    scf.if %2 {
      %cst_15 = arith.constant 0.000000e+00 : f32
      %34 = vector.broadcast %cst_15 : f32 to vector<8x128xf32>
      %c0_16 = arith.constant 0 : index
      %c0_17 = arith.constant 0 : index
      %35 = vector.load %arg3[%c0_16, %c0_17] : memref<8x128xf32, #tpu.memory_space<vmem>>, vector<8x128xf32>
      tpu.vector_store %arg3[%c0_16, %c0_17], %34 {strides = array<i32>} : memref<8x128xf32, #tpu.memory_space<vmem>>, vector<8x128xf32>,
    } else {
    }
    %c0 = arith.constant 0 : index
    %c0_1 = arith.constant 0 : index
    %3 = vector.load %arg1[%c0, %c0_1] : memref<64x32xf32, #tpu.memory_space<vmem>>, vector<64x32xf32>
    %c0_2 = arith.constant 0 : index
    %c0_3 = arith.constant 0 : index
    %4 = vector.load %arg2[%c0_2, %c0_3] : memref<64x1xi32, #tpu.memory_space<vmem>>, vector<64x1xi32>
    %5 = tpu.iota {dimensions = array<i32: 1>} : vector<64x32xi32>
    %6 = vector.broadcast %4 : vector<64x1xi32> to vector<64x32xi32>
    %7 = arith.cmpi eq, %5, %6 : vector<64x32xi32>
    %cst = arith.constant dense<0xFF800000> : vector<64xf32>
    %8 = vector.multi_reduction <maximumf>, %3, %cst [1] : vector<64x32xf32> to vector<64xf32>
    %9 = vector.shape_cast %8 : vector<64xf32> to vector<64x1xf32>
    %10 = vector.broadcast %9 : vector<64x1xf32> to vector<64x32xf32>
    %11 = arith.subf %3, %10 : vector<64x32xf32>
    %12 = math.exp %11 : vector<64x32xf32>
    %cst_4 = arith.constant dense<0.000000e+00> : vector<64xf32>
    %13 = vector.multi_reduction <add>, %12, %cst_4 [1] : vector<64x32xf32> to vector<64xf32>
    %14 = vector.shape_cast %13 : vector<64xf32> to vector<64x1xf32>
    %cst_5 = arith.constant 0.000000e+00 : f32
    %15 = vector.broadcast %cst_5 : f32 to vector<64x32xf32>
    %16 = arith.select %7, %11, %15 : vector<64x32xi1>, vector<64x32xf32>
    %cst_6 = arith.constant dense<0.000000e+00> : vector<64xf32>
    %17 = vector.multi_reduction <add>, %16, %cst_6 [1] : vector<64x32xf32> to vector<64xf32>
    %18 = vector.shape_cast %17 : vector<64xf32> to vector<64x1xf32>
    %19 = math.log %14 : vector<64x1xf32>
    %20 = arith.subf %19, %18 : vector<64x1xf32>
    %cst_7 = arith.constant 1.000000e+01 : f32
    %21 = vector.broadcast %cst_7 : f32 to vector<64x1xf32>
    %22 = arith.mulf %20, %21 : vector<64x1xf32>
    %23 = vector.shape_cast %22 : vector<64x1xf32> to vector<1x64x1xf32>
    %cst_8 = arith.constant dense<0.000000e+00> : vector<1xf32>
    %24 = vector.multi_reduction <add>, %23, %cst_8 [1, 2] : vector<1x64x1xf32> to vector<1xf32>
    %25 = vector.shape_cast %24 : vector<1xf32> to vector<1x1x1xf32>
    %26 = vector.extract %25[0, 0, 0] : f32 from vector<1x1x1xf32>
    %c0_9 = arith.constant 0 : index
    %c0_10 = arith.constant 0 : index
    %27 = vector.load %arg3[%c0_9, %c0_10] : memref<8x128xf32, #tpu.memory_space<vmem>>, vector<8x128xf32>
    %28 = vector.broadcast %26 : f32 to vector<8x128xf32>
    %29 = arith.addf %27, %28 : vector<8x128xf32>
    %c0_11 = arith.constant 0 : index
    %c0_12 = arith.constant 0 : index
    %30 = vector.load %arg3[%c0_11, %c0_12] : memref<8x128xf32, #tpu.memory_space<vmem>>, vector<8x128xf32>
    tpu.vector_store %arg3[%c0_11, %c0_12], %29 {strides = array<i32>} : memref<8x128xf32, #tpu.memory_space<vmem>>, vector<8x128xf32>,
    %c0_i32_13 = arith.constant 0 : i32
    %31 = arith.cmpi eq, %arg0, %c0_i32_13 : i32
    %32 = arith.extui %31 : i1 to i32
    %c0_i32_14 = arith.constant 0 : i32
    %33 = arith.cmpi ne, %32, %c0_i32_14 : i32
    scf.if %33 {
      %c0_15 = arith.constant 0 : index
      %c0_16 = arith.constant 0 : index
      %34 = vector.load %arg3[%c0_15, %c0_16] : memref<8x128xf32, #tpu.memory_space<vmem>>, vector<8x128xf32>
      %cst_17 = arith.constant 6.400000e+01 : f32
      %35 = vector.broadcast %cst_17 : f32 to vector<8x128xf32>
      %36 = arith.divf %34, %35 : vector<8x128xf32>
      %c0_18 = arith.constant 0 : index
      %c0_19 = arith.constant 0 : index
      %37 = vector.load %arg3[%c0_18, %c0_19] : memref<8x128xf32, #tpu.memory_space<vmem>>, vector<8x128xf32>
      tpu.vector_store %arg3[%c0_18, %c0_19], %36 {strides = array<i32>} : memref<8x128xf32, #tpu.memory_space<vmem>>, vector<8x128xf32>,
    } else {
    }
    return
  }
  func.func @transform_0(%arg0: i32) -> (i32, i32) {
    %c0_i32 = arith.constant 0 : i32
    %c0_i32_0 = arith.constant 0 : i32
    return %arg0, %c0_i32 : i32, i32
  }
  func.func @transform_1(%arg0: i32) -> (i32, i32) {
    %c0_i32 = arith.constant 0 : i32
    %c0_i32_0 = arith.constant 0 : i32
    return %arg0, %c0_i32 : i32, i32
  }
  func.func @transform_2(%arg0: i32) -> (i32, i32) {
    %c0_i32 = arith.constant 0 : i32
    %c0_i32_0 = arith.constant 0 : i32
    %c0_i32_1 = arith.constant 0 : i32
    return %c0_i32, %c0_i32_0 : i32, i32
  }
}

</mosaic_0001>

<bundles_post_ra>
// kernel: tpu_custom_call.1
= control target key start
LH: loop header
LB: loop body
LE: loop exit
PB: predicated region body
PF: predicated region fallthrough
CT: control target
= control target key end

     0   :  { %vm67_vm0 = vcmask 261120   ;;  %v317_v6 = vmov 0   ;;  %s454_s0 = inlined_call_operand.vmem [shape: f32[64,32], index: 0, kind: input, shape index: {}]   ;;  %s455_s1 = inlined_call_operand.vmem [shape: s32[64,1], index: 1, kind: input, shape index: {}]   ;;  %s456_s2 = inlined_call_operand.hbm [shape: f32[8,128], index: 2, kind: output, shape index: {}]  }
   0x1   :  { %v19_v0 = vld [vmem:[%s454_s0 + $0x10] sm:$0xff]  ;;  %v17_v1 = vld [vmem:[%s454_s0] sm:$0xff]  ;;  %v20_v2 = vld [vmem:[%s454_s0 + $0x18] sm:$0xff]  ;;  %260 = vset.pattern.permute.xlu1 %v317_v6  ;;  %259 = vset.pattern.permute.xlu0 %v317_v6 }
   0x2   :  { %v74_v3 = vsel %vm67_vm0, %v19_v0, -inf  ;;  %v68_v4 = vsel %vm67_vm0, %v17_v1, -inf  ;;  %v18_v5 = vld [vmem:[%s454_s0 + $0x8] sm:$0xff]  ;;  %v77_v7 = vsel %vm67_vm0, %v20_v2, -inf  ;;  %v21_v10 = vld [vmem:[%s454_s0 + $0x20] sm:$0xff] }
   0x3   :  { %75 = vmax.xlane.f32.xlu1 %v74_v3  ;;  %69 = vmax.xlane.f32.xlu0 %v68_v4  ;;  %v71_v8 = vsel %vm67_vm0, %v18_v5, -inf  ;;  %v22_v9 = vld [vmem:[%s454_s0 + $0x28] sm:$0xff] }
   0x4   :  { %7 = vsyncpa [#allocation3], 0  ;;  %v83_v11 = vsel %vm67_vm0, %v22_v9, -inf  ;;  %v80_v12 = vsel %vm67_vm0, %v21_v10, -inf  ;;  %v24_v13 = vld [vmem:[%s454_s0 + $0x38] sm:$0xff]  ;;  %v23_v14 = vld [vmem:[%s454_s0 + $0x30] sm:$0xff]  ;;  %v33_v53 = vlaneseq }
   0x5   :  { %v89_v15 = vsel %vm67_vm0, %v24_v13, -inf  ;;  %v86_v16 = vsel %vm67_vm0, %v23_v14, -inf  ;;  %v26_v17 = vld [vmem:[%s455_s1 + $0x8] sm:$0xff]  ;;  %v27_v18 = vld [vmem:[%s455_s1 + $0x10] sm:$0xff]  ;;  %v25_v19 = vld [vmem:[%s455_s1] sm:$0xff]  ;;  %vm204_vm9 = vcmask 7168  }
   0x6   :  { %v28_v20 = vld [vmem:[%s455_s1 + $0x18] sm:$0xff]  ;;  %v29_v21 = vld [vmem:[%s455_s1 + $0x20] sm:$0xff]  ;;  %v30_v22 = vld [vmem:[%s455_s1 + $0x28] sm:$0xff]  ;;  %v34_v60 = vand.u32 127, %v33_v53  ;;  %s318_s12 = smov [#allocation2]  }
   0x7   :  { %78 = vmax.xlane.f32.xlu1 %v77_v7  ;;  %72 = vmax.xlane.f32.xlu0 %v71_v8  ;;  %v31_v23 = vld [vmem:[%s455_s1 + $0x30] sm:$0xff]  ;;  %v32_v24 = vld [vmem:[%s455_s1 + $0x38] sm:$0xff]  ;;  %s246_s13 = sshll.u32 %s318_s12, 4  ;;  %s247_s13 = int_to_ptr.vmem [resolvable:$true] %s246_s13 }
   0x8   :  { %s293_s14 = scalar_lea.vmem %s247_s13, 128  ;;  %p298_p1 = scmp.lt.s32.totalorder %s247_s13, %s247_s13 }
   0x9   :  { %p294_p0 = scmp.ne.s32.totalorder %s247_s13, %s293_s14  ;;  %p299_p2 = scmp.lt.s32.totalorder %s293_s14, %s293_s14 }
   0xb   :  { %84 = vmax.xlane.f32.xlu1 %v83_v11  ;;  %81 = vmax.xlane.f32.xlu0 %v80_v12  ;;  %p300_p3 = por %p299_p2, %p298_p1 }
   0xd   :  { %p301_p4 = pnand %p300_p3, %p294_p0 }
   0xf   :  { %90 = vmax.xlane.f32.xlu1 %v89_v15  ;;  %87 = vmax.xlane.f32.xlu0 %v86_v16 }
  0x20   :  { %39 = vperm.xlu1 %260, %v26_v17  }
  0x24   :  { %42 = vperm.xlu1 %260, %v27_v18  }
  0x25   :  { %36 = vperm.xlu0 %259, %v25_v19  }
  0x28   :  { %45 = vperm.xlu1 %260, %v28_v20  }
  0x2c   :  { %48 = vperm.xlu1 %260, %v29_v21  }
  0x30   :  { %51 = vperm.xlu1 %260, %v30_v22  }
  0x34   :  { %54 = vperm.xlu1 %260, %v31_v23  }
  0x38   :  { %57 = vperm.xlu1 %260, %v32_v24  }
  0x90   :  { %v76_v25 = vpop.xlane.xlu1 %75  ;;  %v70_v26 = vpop.xlane.xlu0 %69 }
  0x91   :  { %v390_v27 = vsub.f32 %v17_v1, %v70_v26  ;;  %v393_v29 = vsub.f32 %v19_v0, %v76_v25 }
  0x93   :  { %v100_v28 = vmul.f32 1.442695, %v390_v27  ;;  %v104_v36 = vmul.f32 1.442695, %v393_v29 }
  0x94   :  { %v79_v30 = vpop.xlane.xlu1 %78  ;;  %v73_v31 = vpop.xlane.xlu0 %72 }
  0x95   :  { %v395_v32 = vsub.f32 %v20_v2, %v79_v30  ;;  %v93_v33 = vsub.f32 %v18_v5, %v73_v31  ;;  %261 = vpow2.f32 %v100_v28 }
  0x97   :  { %v106_v34 = vmul.f32 1.442695, %v395_v32  ;;  %v102_v35 = vmul.f32 1.442695, %v93_v33 }
  0x98   :  { %v85_v37 = vpop.xlane.xlu1 %84  ;;  %v82_v38 = vpop.xlane.xlu0 %81 }
  0x99   :  { %263 = vpow2.f32 %v106_v34  ;;  %v399_v39 = vsub.f32 %v22_v9, %v85_v37  ;;  %v401_v40 = vsub.f32 %v21_v10, %v82_v38 }
  0x9a   :  { %265 = vpow2.f32 %v102_v35 }
  0x9b   :  { %v110_v41 = vmul.f32 1.442695, %v399_v39  ;;  %v108_v42 = vmul.f32 1.442695, %v401_v40  ;;  %267 = vpow2.f32 %v104_v36 }
  0x9c   :  { %v91_v43 = vpop.xlane.xlu1 %90  ;;  %v88_v44 = vpop.xlane.xlu0 %87 }
  0x9d   :  { %269 = vpow2.f32 %v110_v41  ;;  %v405_v45 = vsub.f32 %v24_v13, %v91_v43  ;;  %v407_v46 = vsub.f32 %v23_v14, %v88_v44 }
  0x9e   :  { %271 = vpow2.f32 %v108_v42 }
  0x9f   :  { %v114_v47 = vmul.f32 1.442695, %v405_v45  ;;  %v112_v48 = vmul.f32 1.442695, %v407_v46  ;;  %v262_v49 = vpop.eup %261 }
  0xa0   :  { %v40_v50 = vpop.permute.xlu1 %39  ;;  %v116_v51 = vsel %vm67_vm0, %v262_v49, 0.0 }
  0xa1   :  { %273 = vpow2.f32 %v114_v47  ;;  %117 = vadd.xlane.f32.xlu1 %v116_v51  ;;  %vm60_vm1 = vcmp.eq.s32.totalorder %v34_v60, %v40_v50 }
  0xa2   :  { %275 = vpow2.f32 %v112_v48  ;;  %v141_v7 = vsel %vm60_vm1, %v93_v33, 0.0 }
  0xa3   :  { %v264_v52 = vpop.eup %263  ;;  %v151_v10 = vsel %vm67_vm0, %v141_v7, 0.0 }
  0xa4   :  { %v266_v54 = vpop.eup %265  ;;  %v43_v55 = vpop.permute.xlu1 %42  ;;  %v125_v56 = vsel %vm67_vm0, %v264_v52, 0.0 }
  0xa5   :  { %v119_v57 = vsel %vm67_vm0, %v266_v54, 0.0  ;;  %v268_v58 = vpop.eup %267  ;;  %126 = vadd.xlane.f32.xlu1 %v125_v56  ;;  %v37_v4 = vpop.permute.xlu0 %36  ;;  %vm61_vm4 = vcmp.eq.s32.totalorder %v34_v60, %v43_v55 }
  0xa6   :  { %120 = vadd.xlane.f32.xlu0 %v119_v57  ;;  %v122_v0 = vsel %vm67_vm0, %v268_v58, 0.0  ;;  %vm59_vm2 = vcmp.eq.s32.totalorder %v34_v60, %v37_v4  ;;  %v142_v17 = vsel %vm61_vm4, %v393_v29, 0.0 }
  0xa7   :  { %v270_v59 = vpop.eup %269  ;;  %v140_v12 = vsel %vm59_vm2, %v390_v27, 0.0  ;;  %v154_v20 = vsel %vm67_vm0, %v142_v17, 0.0 }
  0xa8   :  { %v272_v61 = vpop.eup %271  ;;  %v46_v62 = vpop.permute.xlu1 %45  ;;  %v131_v63 = vsel %vm67_vm0, %v270_v59, 0.0  ;;  %v148_v15 = vsel %vm67_vm0, %v140_v12, 0.0 }
  0xa9   :  { %132 = vadd.xlane.f32.xlu1 %v131_v63  ;;  %v128_v2 = vsel %vm67_vm0, %v272_v61, 0.0  ;;  %vm62_vm3 = vcmp.eq.s32.totalorder %v34_v60, %v46_v62 }
  0xaa   :  { %123 = vadd.xlane.f32.xlu0 %v122_v0  ;;  %v143_v11 = vsel %vm62_vm3, %v395_v32, 0.0 }
  0xab   :  { %v274_v1 = vpop.eup %273  ;;  %v157_v14 = vsel %vm67_vm0, %v143_v11, 0.0 }
  0xac   :  { %v276_v3 = vpop.eup %275  ;;  %v49_v5 = vpop.permute.xlu1 %48  ;;  %v137_v6 = vsel %vm67_vm0, %v274_v1, 0.0 }
  0xad   :  { %138 = vadd.xlane.f32.xlu1 %v137_v6  ;;  %v134_v8 = vsel %vm67_vm0, %v276_v3, 0.0  ;;  %vm63_vm6 = vcmp.eq.s32.totalorder %v34_v60, %v49_v5 }
  0xae   :  { %129 = vadd.xlane.f32.xlu0 %v128_v2  ;;  %v144_v22 = vsel %vm63_vm6, %v401_v40, 0.0 }
  0xaf   :  { %v160_v24 = vsel %vm67_vm0, %v144_v22, 0.0 }
  0xb0   :  { %v52_v9 = vpop.permute.xlu1 %51 }
  0xb1   :  { %152 = vadd.xlane.f32.xlu1 %v151_v10  ;;  %vm64_vm5 = vcmp.eq.s32.totalorder %v34_v60, %v52_v9 }
  0xb2   :  { %135 = vadd.xlane.f32.xlu0 %v134_v8  ;;  %v145_v16 = vsel %vm64_vm5, %v399_v39, 0.0 }
  0xb3   :  { %v163_v19 = vsel %vm67_vm0, %v145_v16, 0.0 }
  0xb4   :  { %v55_v13 = vpop.permute.xlu1 %54 }
  0xb5   :  { %158 = vadd.xlane.f32.xlu1 %v157_v14  ;;  %vm65_vm8 = vcmp.eq.s32.totalorder %v34_v60, %v55_v13 }
  0xb6   :  { %149 = vadd.xlane.f32.xlu0 %v148_v15  ;;  %v146_v25 = vsel %vm65_vm8, %v407_v46, 0.0 }
  0xb7   :  { %v166_v26 = vsel %vm67_vm0, %v146_v25, 0.0 }
  0xb8   :  { %v58_v18 = vpop.permute.xlu1 %57 }
  0xb9   :  { %vm66_vm7 = vcmp.eq.s32.totalorder %v34_v60, %v58_v18  ;;  %164 = vadd.xlane.f32.xlu1 %v163_v19 }
  0xba   :  { %155 = vadd.xlane.f32.xlu0 %v154_v20  ;;  %v147_v21 = vsel %vm66_vm7, %v405_v45, 0.0 }
  0xbb   :  { %v169_v23 = vsel %vm67_vm0, %v147_v21, 0.0 }
  0xbd   :  { %170 = vadd.xlane.f32.xlu1 %v169_v23 }
  0xbe   :  { %161 = vadd.xlane.f32.xlu0 %v160_v24 }
  0xc2   :  { %167 = vadd.xlane.f32.xlu0 %v166_v26 }
 0x12e   :  { %v118_v27 = vpop.xlane.xlu1 %117 }
 0x12f   :  { %277 = vlog2.f32 %v118_v27 }
 0x132   :  { %v127_v28 = vpop.xlane.xlu1 %126 }
 0x133   :  { %v121_v29 = vpop.xlane.xlu0 %120  ;;  %279 = vlog2.f32 %v127_v28 }
 0x134   :  { %281 = vlog2.f32 %v121_v29 }
 0x136   :  { %v133_v30 = vpop.xlane.xlu1 %132 }
 0x137   :  { %v124_v31 = vpop.xlane.xlu0 %123  ;;  %283 = vlog2.f32 %v133_v30 }
 0x138   :  { %285 = vlog2.f32 %v124_v31 }
 0x139   :  { %v278_v34 = vpop.eup %277 }
 0x13a   :  { %v139_v32 = vpop.xlane.xlu1 %138  ;;  %v173_v43 = vmul.f32 0.6931472, %v278_v34 }
 0x13b   :  { %v130_v33 = vpop.xlane.xlu0 %129  ;;  %287 = vlog2.f32 %v139_v32 }
 0x13c   :  { %289 = vlog2.f32 %v130_v33 }
 0x13d   :  { %v280_v35 = vpop.eup %279 }
 0x13e   :  { %v282_v36 = vpop.eup %281  ;;  %v153_v37 = vpop.xlane.xlu1 %152  ;;  %v179_v40 = vmul.f32 0.6931472, %v280_v35 }
 0x13f   :  { %v136_v38 = vpop.xlane.xlu0 %135  ;;  %v175_v39 = vmul.f32 0.6931472, %v282_v36 }
 0x140   :  { %291 = vlog2.f32 %v136_v38 }
 0x141   :  { %v284_v41 = vpop.eup %283  ;;  %v189_v42 = vsub.f32 %v175_v39, %v153_v37 }
 0x142   :  { %v286_v44 = vpop.eup %285  ;;  %v159_v45 = vpop.xlane.xlu1 %158  ;;  %v183_v52 = vmul.f32 0.6931472, %v284_v41 }
 0x143   :  { %v150_v46 = vpop.xlane.xlu0 %149  ;;  %v197_v48 = vmul.f32 10.0, %v189_v42  ;;  %v191_v49 = vsub.f32 %v179_v40, %v159_v45  ;;  %v177_v53 = vmul.f32 0.6931472, %v286_v44 }
 0x144   :  { %v188_v47 = vsub.f32 %v173_v43, %v150_v46 }
 0x145   :  { %v288_v50 = vpop.eup %287  ;;  %v206_v59 = vsel %vm204_vm9, %v197_v48, 0.0  ;;  %v199_v60 = vmul.f32 10.0, %v191_v49 }
 0x146   :  { %v196_v51 = vmul.f32 10.0, %v188_v47  ;;  %v290_v54 = vpop.eup %289  ;;  %v165_v55 = vpop.xlane.xlu1 %164  ;;  %v187_v63 = vmul.f32 0.6931472, %v288_v50 }
 0x147   :  { %v156_v56 = vpop.xlane.xlu0 %155  ;;  %v193_v61 = vsub.f32 %v183_v52, %v165_v55  ;;  %v181_v0 = vmul.f32 0.6931472, %v290_v54  ;;  %v210_v7 = vsel %vm204_vm9, %v199_v60, 0.0 }
 0x148   :  { %v205_v57 = vsel %vm204_vm9, %v196_v51, 0.0  ;;  %v190_v58 = vsub.f32 %v177_v53, %v156_v56 }
 0x149   :  { %v207_v2 = vadd.f32 %v206_v59, %v205_v57  ;;  %v201_v9 = vmul.f32 10.0, %v193_v61 }
 0x14a   :  { %v198_v62 = vmul.f32 10.0, %v190_v58  ;;  %v292_v1 = vpop.eup %291  ;;  %v171_v3 = vpop.xlane.xlu1 %170 }
 0x14b   :  { %v162_v4 = vpop.xlane.xlu0 %161  ;;  %v195_v10 = vsub.f32 %v187_v63, %v171_v3  ;;  %v185_v12 = vmul.f32 0.6931472, %v292_v1  ;;  %v214_v18 = vsel %vm204_vm9, %v201_v9, 0.0 }
 0x14c   :  { %v208_v5 = vsel %vm204_vm9, %v198_v62, 0.0  ;;  %v192_v6 = vsub.f32 %v181_v0, %v162_v4 }
 0x14d   :  { %v209_v8 = vadd.f32 %v208_v5, %v207_v2  ;;  %v203_v19 = vmul.f32 10.0, %v195_v10 }
 0x14e   :  { %v200_v11 = vmul.f32 10.0, %v192_v6 }
 0x14f   :  { %v211_v13 = vadd.f32 %v210_v7, %v209_v8  ;;  %v168_v14 = vpop.xlane.xlu0 %167  ;;  %v218_v24 = vsel %vm204_vm9, %v203_v19, 0.0 }
 0x150   :  { %v212_v15 = vsel %vm204_vm9, %v200_v11, 0.0  ;;  %v194_v16 = vsub.f32 %v185_v12, %v168_v14 }
 0x151   :  { %v213_v17 = vadd.f32 %v212_v15, %v211_v13 }
 0x152   :  { %v202_v20 = vmul.f32 10.0, %v194_v16 }
 0x153   :  { %v215_v21 = vadd.f32 %v214_v18, %v213_v17 }
 0x154   :  { %v216_v22 = vsel %vm204_vm9, %v202_v20, 0.0 }
 0x155   :  { %v217_v23 = vadd.f32 %v216_v22, %v215_v21 }
 0x157   :  { %v219_v25 = vadd.f32 %v218_v24, %v217_v23 }
 0x159   :  { %220 = vadd.xlane.f32.xlu0 %v219_v25 }
 0x1e6   :  { %v221_v26 = vpop.xlane.xlu0 %220 }
 0x1e7   :  { %v222_v27 = vrot.slane %v221_v26, 4 }
 0x1e9   :  { %v223_v28 = vadd.f32 %v222_v27, %v221_v26 }
 0x1eb   :  { %v224_v29 = vrot.slane %v223_v28, 2 }
 0x1ed   :  { %v225_v30 = vadd.f32 %v224_v29, %v223_v28 }
 0x1ef   :  { %v226_v31 = vrot.slane %v225_v30, 1 }
 0x1f1   :  { %v227_v32 = vadd.f32 %v226_v31, %v225_v30 }
 0x1f3   :  { %254 = vpush %v227_v32 }
 0x224   :  { %s255_s1 = spop %254 }
 0x225   :  { %v230_v33 = vstv %s255_s1 }
 0x226   :  { %v238_v34 = vmul.f32 0.015625, %v230_v33 }
 0x228   :  { %239 = vst [vmem:[#allocation2] sm:$0xff] %v238_v34 }
 0x229   :  { %304 = shalt.err (!%p301_p4)
}
 0x22a   :  { %s305_s17 = scalar_lea.hbm %s456_s2, 128 }
 0x22b   :  { %p306_p5 = scmp.ne.s32.totalorder %s456_s2, %s305_s17  ;;  %p309_p6 = scmp.lt.u32.totalorder %s305_s17, %s456_s2 }
 0x22d   :  { %p311_p7 = pnand %p309_p6, %p306_p5 }
 0x22f   :  { %314 = shalt.err (!%p311_p7)
}
 0x230   :  { %249 = dma.vmem_to_hbm [thread:$0]  %s247_s13, 128, %s456_s2, [#allocation3]  }
 0x231   :  { %315 = dma.done.wait [#allocation3], 128  }
 0x232   :  { %316 = vsyncadd [#allocation3], 4294967168 }
 0x233   :  { %253 = vsyncpa [#allocation3], 1 }

</bundles_post_ra>
